<compile_context>
chip_gen: v5e
topology: v5e:2x2
jax: 0.10.0
libtpu: 0.0.40
codegen_flags: <defaults>
</compile_context>

<pallas_src>
import functools

import jax
import jax.numpy as jnp
from jax.experimental import pallas as pl
from jax.experimental.pallas import tpu as pltpu

D_IN, D_H1, D_H2, D_OUT = 9, 16, 8, 1


def mlp_kernel(x_ref, w1_ref, b1_ref, w2_ref, b2_ref, w3_ref, b3_ref, o_ref):
    x = x_ref[...]                                               # (9, TB)

    # fc1 + relu
    h1 = jnp.dot(w1_ref[...], x, preferred_element_type=jnp.float32)
    h1 = jnp.maximum(h1 + b1_ref[...], 0.0)                      # (16, TB)

    # fc2 + relu
    h2 = jnp.dot(w2_ref[...], h1, preferred_element_type=jnp.float32)
    h2 = jnp.maximum(h2 + b2_ref[...], 0.0)                      # (8, TB)

    # fc3 + sigmoid (EUP exp keeps the epilogue off the VALU slots)
    h3 = jnp.dot(w3_ref[...], h2, preferred_element_type=jnp.float32)
    h3 = h3 + b3_ref[...]                                        # (1, TB)
    o_ref[...] = jax.nn.sigmoid(h3)


def _net_forward_impl(x, params, tile_b):
    """x: (B, 9) float32  ->  (B, 1) float32."""
    w1, b1, w2, b2, w3, b3 = params
    B = x.shape[0]

    # Lane-aligned batch tile; clamp so small batches still run one step.
    b_aligned = pl.cdiv(B, 128) * 128
    tile_b = pl.cdiv(int(tile_b), 128) * 128
    tile_b = max(128, min(tile_b, b_aligned))
    b_pad = pl.cdiv(B, tile_b) * tile_b

    # Wrapper-side layout plumbing: batch-on-lanes + pad to the tile multiple.
    x_t = jnp.zeros((D_IN, b_pad), x.dtype).at[:, :B].set(x.T)

    const = lambda i: (0, 0)   # weights/biases resident across the batch grid

    out_t = pl.pallas_call(
        mlp_kernel,
        out_shape=jax.ShapeDtypeStruct((D_OUT, b_pad), jnp.float32),
        grid_spec=pltpu.PrefetchScalarGridSpec(
            num_scalar_prefetch=0,
            grid=(b_pad // tile_b,),
            in_specs=[
                pl.BlockSpec((D_IN, tile_b), lambda i: (0, i)),   # x tile streams
                pl.BlockSpec((D_H1, D_IN), const),                # w1 (16, 9)
                pl.BlockSpec((D_H1, 1), const),                   # b1 (16, 1)
                pl.BlockSpec((D_H2, D_H1), const),                # w2 (8, 16)
                pl.BlockSpec((D_H2, 1), const),                   # b2 (8, 1)
                pl.BlockSpec((D_OUT, D_H2), const),               # w3 (1, 8)
                pl.BlockSpec((D_OUT, 1), const),                  # b3 (1, 1)
            ],
            out_specs=pl.BlockSpec((D_OUT, tile_b), lambda i: (0, i)),
        ),
        compiler_params=pltpu.CompilerParams(
            dimension_semantics=("parallel",),
        ),
    )(x_t, w1, b1, w2, b2, w3, b3)

    return out_t[:, :B].T                                        # (B, 1)


# jit so the layout plumbing (transpose/pad/slice) fuses around the kernel call.
net_forward = jax.jit(
    functools.partial(_net_forward_impl),
    static_argnames=("tile_b",),
)


def init_params(key):
    """PyTorch-style Linear init: U(-1/sqrt(fan_in), 1/sqrt(fan_in)).
    Weights stored (out_features, in_features); biases (out_features, 1)."""
    dims = [(D_IN, D_H1), (D_H1, D_H2), (D_H2, D_OUT)]
    params = []
    for fan_in, fan_out in dims:
        key, kw, kb = jax.random.split(key, 3)
        bound = 1.0 / jnp.sqrt(float(fan_in))
        w = jax.random.uniform(kw, (fan_out, fan_in), jnp.float32, -bound, bound)
        b = jax.random.uniform(kb, (fan_out, 1), jnp.float32, -bound, bound)
        params += [w, b]
    return tuple(params)


def net_forward_ref(x, params):
    """Pure-JAX reference (PyTorch semantics: y = x @ W^T + b)."""
    w1, b1, w2, b2, w3, b3 = params
    h = jax.nn.relu(x @ w1.T + b1[:, 0])
    h = jax.nn.relu(h @ w2.T + b2[:, 0])
    return jax.nn.sigmoid(h @ w3.T + b3[:, 0])


if __name__ == "__main__":
    key = jax.random.PRNGKey(0)
    key, kx = jax.random.split(key)
    params = init_params(key)

    # Small demo batch (single grid step, padded to one 128-lane tile).
    B = 8
    x = jax.random.normal(kx, (B, D_IN), jnp.float32)
    out = jax.block_until_ready(net_forward(x, params, tile_b=65536))
    ref = net_forward_ref(x, params)
    assert out.shape == (B, 1), out.shape
    assert jnp.allclose(out, ref, atol=1e-5, rtol=1e-5)

    # Exercise the multi-step batch grid + padding path (3 tiles of 128 rows).
    key, kx2 = jax.random.split(key)
    B2 = 300
    x2 = jax.random.normal(kx2, (B2, D_IN), jnp.float32)
    out2 = jax.block_until_ready(net_forward(x2, params, tile_b=128))
    ref2 = net_forward_ref(x2, params)
    assert out2.shape == (B2, 1), out2.shape
    assert jnp.allclose(out2, ref2, atol=1e-5, rtol=1e-5)

    print("KERNEL_OK")
</pallas_src>

<mosaic_0001>
module attributes {stable_mosaic.version = 11 : i64} {
  func.func @mlp_kernel(%arg0: i32, %arg1: memref<9x128xf32, #tpu.memory_space<vmem>>, %arg2: memref<16x9xf32, #tpu.memory_space<vmem>>, %arg3: memref<16x1xf32, #tpu.memory_space<vmem>>, %arg4: memref<8x16xf32, #tpu.memory_space<vmem>>, %arg5: memref<8x1xf32, #tpu.memory_space<vmem>>, %arg6: memref<1x8xf32, #tpu.memory_space<vmem>>, %arg7: memref<1x1xf32, #tpu.memory_space<vmem>>, %arg8: memref<1x128xf32, #tpu.memory_space<vmem>>) attributes {dimension_semantics = [#tpu.dimension_semantics<parallel>], iteration_bounds = array<i64: 1>, scalar_prefetch = 0 : i64, scratch_operands = 0 : i64, tpu.core_type = #tpu.core_type<tc>, window_params = [{transform_indices = @transform_0, window_bounds = array<i64: 9, 128>}, {pipeline_mode = #tpu.pipeline_mode<synchronous>, transform_indices = @transform_1, window_bounds = array<i64: 16, 9>}, {pipeline_mode = #tpu.pipeline_mode<synchronous>, transform_indices = @transform_2, window_bounds = array<i64: 16, 1>}, {pipeline_mode = #tpu.pipeline_mode<synchronous>, transform_indices = @transform_3, window_bounds = array<i64: 8, 16>}, {pipeline_mode = #tpu.pipeline_mode<synchronous>, transform_indices = @transform_4, window_bounds = array<i64: 8, 1>}, {pipeline_mode = #tpu.pipeline_mode<synchronous>, transform_indices = @transform_5, window_bounds = array<i64: 1, 8>}, {pipeline_mode = #tpu.pipeline_mode<synchronous>, transform_indices = @transform_6, window_bounds = array<i64: 1, 1>}, {transform_indices = @transform_7, window_bounds = array<i64: 1, 128>}]} {
    %c0 = arith.constant 0 : index
    %c0_0 = arith.constant 0 : index
    %0 = vector.load %arg1[%c0, %c0_0] : memref<9x128xf32, #tpu.memory_space<vmem>>, vector<9x128xf32>
    %c0_1 = arith.constant 0 : index
    %c0_2 = arith.constant 0 : index
    %1 = vector.load %arg2[%c0_1, %c0_2] : memref<16x9xf32, #tpu.memory_space<vmem>>, vector<16x9xf32>
    %cst = arith.constant dense<0.000000e+00> : vector<16x128xf32>
    %2 = tpu.matmul %1, %0, %cst {dimension_numbers = #tpu.dot_dimension_numbers<[1], [0], [0], [1], [0, 0, 1, 1], [], []>} : vector<16x9xf32>, vector<9x128xf32>, vector<16x128xf32> -> vector<16x128xf32>
    %c0_3 = arith.constant 0 : index
    %c0_4 = arith.constant 0 : index
    %3 = vector.load %arg3[%c0_3, %c0_4] : memref<16x1xf32, #tpu.memory_space<vmem>>, vector<16x1xf32>
    %4 = vector.broadcast %3 : vector<16x1xf32> to vector<16x128xf32>
    %5 = arith.addf %2, %4 : vector<16x128xf32>
    %cst_5 = arith.constant 0.000000e+00 : f32
    %6 = vector.broadcast %cst_5 : f32 to vector<16x128xf32>
    %7 = arith.maximumf %5, %6 : vector<16x128xf32>
    %c0_6 = arith.constant 0 : index
    %c0_7 = arith.constant 0 : index
    %8 = vector.load %arg4[%c0_6, %c0_7] : memref<8x16xf32, #tpu.memory_space<vmem>>, vector<8x16xf32>
    %cst_8 = arith.constant dense<0.000000e+00> : vector<8x128xf32>
    %9 = tpu.matmul %8, %7, %cst_8 {dimension_numbers = #tpu.dot_dimension_numbers<[1], [0], [0], [1], [0, 0, 1, 1], [], []>} : vector<8x16xf32>, vector<16x128xf32>, vector<8x128xf32> -> vector<8x128xf32>
    %c0_9 = arith.constant 0 : index
    %c0_10 = arith.constant 0 : index
    %10 = vector.load %arg5[%c0_9, %c0_10] : memref<8x1xf32, #tpu.memory_space<vmem>>, vector<8x1xf32>
    %11 = vector.broadcast %10 : vector<8x1xf32> to vector<8x128xf32>
    %12 = arith.addf %9, %11 : vector<8x128xf32>
    %cst_11 = arith.constant 0.000000e+00 : f32
    %13 = vector.broadcast %cst_11 : f32 to vector<8x128xf32>
    %14 = arith.maximumf %12, %13 : vector<8x128xf32>
    %c0_12 = arith.constant 0 : index
    %c0_13 = arith.constant 0 : index
    %15 = vector.load %arg6[%c0_12, %c0_13] : memref<1x8xf32, #tpu.memory_space<vmem>>, vector<1x8xf32>
    %cst_14 = arith.constant dense<0.000000e+00> : vector<1x128xf32>
    %16 = tpu.matmul %15, %14, %cst_14 {dimension_numbers = #tpu.dot_dimension_numbers<[1], [0], [0], [1], [0, 0, 1, 1], [], []>} : vector<1x8xf32>, vector<8x128xf32>, vector<1x128xf32> -> vector<1x128xf32>
    %c0_15 = arith.constant 0 : index
    %c0_16 = arith.constant 0 : index
    %17 = vector.load %arg7[%c0_15, %c0_16] : memref<1x1xf32, #tpu.memory_space<vmem>>, vector<1x1xf32>
    %18 = vector.broadcast %17 : vector<1x1xf32> to vector<1x128xf32>
    %19 = arith.addf %16, %18 : vector<1x128xf32>
    %20 = arith.negf %19 : vector<1x128xf32>
    %21 = math.exp %20 : vector<1x128xf32>
    %cst_17 = arith.constant 1.000000e+00 : f32
    %22 = vector.broadcast %cst_17 : f32 to vector<1x128xf32>
    %23 = arith.addf %22, %21 : vector<1x128xf32>
    %24 = arith.divf %22, %23 : vector<1x128xf32>
    %c0_18 = arith.constant 0 : index
    %c0_19 = arith.constant 0 : index
    %25 = vector.load %arg8[%c0_18, %c0_19] : memref<1x128xf32, #tpu.memory_space<vmem>>, vector<1x128xf32>
    tpu.vector_store %arg8[%c0_18, %c0_19], %24 {strides = array<i32>} : memref<1x128xf32, #tpu.memory_space<vmem>>, vector<1x128xf32>,
    return
  }
  func.func @transform_0(%arg0: i32) -> (i32, i32) {
    %c0_i32 = arith.constant 0 : i32
    %c0_i32_0 = arith.constant 0 : i32
    return %c0_i32, %arg0 : i32, i32
  }
  func.func @transform_1(%arg0: i32) -> (i32, i32) {
    %c0_i32 = arith.constant 0 : i32
    %c0_i32_0 = arith.constant 0 : i32
    %c0_i32_1 = arith.constant 0 : i32
    return %c0_i32, %c0_i32_0 : i32, i32
  }
  func.func @transform_2(%arg0: i32) -> (i32, i32) {
    %c0_i32 = arith.constant 0 : i32
    %c0_i32_0 = arith.constant 0 : i32
    %c0_i32_1 = arith.constant 0 : i32
    return %c0_i32, %c0_i32_0 : i32, i32
  }
  func.func @transform_3(%arg0: i32) -> (i32, i32) {
    %c0_i32 = arith.constant 0 : i32
    %c0_i32_0 = arith.constant 0 : i32
    %c0_i32_1 = arith.constant 0 : i32
    return %c0_i32, %c0_i32_0 : i32, i32
  }
  func.func @transform_4(%arg0: i32) -> (i32, i32) {
    %c0_i32 = arith.constant 0 : i32
    %c0_i32_0 = arith.constant 0 : i32
    %c0_i32_1 = arith.constant 0 : i32
    return %c0_i32, %c0_i32_0 : i32, i32
  }
  func.func @transform_5(%arg0: i32) -> (i32, i32) {
    %c0_i32 = arith.constant 0 : i32
    %c0_i32_0 = arith.constant 0 : i32
    %c0_i32_1 = arith.constant 0 : i32
    return %c0_i32, %c0_i32_0 : i32, i32
  }
  func.func @transform_6(%arg0: i32) -> (i32, i32) {
    %c0_i32 = arith.constant 0 : i32
    %c0_i32_0 = arith.constant 0 : i32
    %c0_i32_1 = arith.constant 0 : i32
    return %c0_i32, %c0_i32_0 : i32, i32
  }
  func.func @transform_7(%arg0: i32) -> (i32, i32) {
    %c0_i32 = arith.constant 0 : i32
    %c0_i32_0 = arith.constant 0 : i32
    return %c0_i32, %arg0 : i32, i32
  }
}

</mosaic_0001>

<bundles_post_ra>
// kernel: _net_forward_impl.1
= control target key start
LH: loop header
LB: loop body
LE: loop exit
PB: predicated region body
PF: predicated region fallthrough
CT: control target
= control target key end

     0   :  { %vm51_vm0 = vcmask 1040384   ;;  %v183_v2 = vmov 0   ;;  %vm44_vm1 = vcmask 72704   ;;  %vm87_vm2 = vcmask 130048   ;;  %s257_s0 = inlined_call_operand.vmem [shape: f32[9,128], index: 0, kind: input, shape index: {}]   ;;  %s258_s1 = inlined_call_operand.vmem [shape: f32[16,9], index: 1, kind: input, shape index: {}]   ;;  %s259_s2 = inlined_call_operand.vmem [shape: f32[16,1], index: 2, kind: input, shape index: {}]   ;;  %s260_s4 = inlined_call_operand.vmem [shape: f32[8,1], index: 4, kind: input, shape index: {}]   ;;  %s261_s6 = inlined_call_operand.<no memory space> [shape: f32[1,1], index: 6, kind: input, shape index: {}]   ;;  %s262_s3 = inlined_call_operand.vmem [shape: f32[8,16], index: 3, kind: input, shape index: {}]   ;;  %s263_s5 = inlined_call_operand.vmem [shape: f32[1,8], index: 5, kind: input, shape index: {}]   ;;  %s264_s7 = inlined_call_operand.vmem [shape: f32[1,128], index: 7, kind: output, shape index: {}]  }
   0x1   :  { %v29_v0 = vld [vmem:[%s257_s0 + $0x8] sm:$0x1]  ;;  %v28_v1 = vld [vmem:[%s257_s0] sm:$0xff]  ;;  %177 = vset.pattern.permute.xlu0 %v183_v2  ;;  %178 = vset.pattern.permute.xlu1 %v183_v2  ;;  %v12_v8 = vstv %s261_s6  ;;  %vm120_vm3 = vcmask 64512  }
   0x2   :  { %168 = vmatpush.msk.msra.mxu0 %vm51_vm0, %v29_v0  ;;  %174 = vmatpush.msk.msra.mxu3 %vm51_vm0, %v29_v0  ;;  %v30_v3 = vld [vmem:[%s258_s1] sm:$0xff]  ;;  %v31_v4 = vld [vmem:[%s258_s1 + $0x8] sm:$0xff]  ;;  %13 = vst [vmem:[#allocation2] sm:$0x1] %v12_v8 }
   0x3   :  { %v33_v5 = vld [vmem:[%s259_s2 + $0x8] sm:$0xff]  ;;  %v32_v6 = vld [vmem:[%s259_s2] sm:$0xff] }
   0x4   :  { %41 = vperm.xlu0 %177, %v33_v5   ;;  %70 = vmatpush.msra.mxu0 %v28_v1  ;;  %v81_v7 = vld [vmem:[%s260_s4] sm:$0xff] }
   0x5   :  { %175 = vmatpush.msra.mxu3 %v28_v1  ;;  %169 = vmatmul.msk.f32.vlgmr.msra.gmra.mxu0 %vm44_vm1, %v30_v3  ;;  %v80_v18 = vld [vmem:[%s262_s3] sm:$0xff] }
   0x6   :  { %170 = vmatmul.msk.f32.vlgmr.msra.gmra.mxu3 %vm44_vm1, %v31_v4  ;;  %84 = vperm.xlu1 %178, %v81_v7   ;;  %v112_v23 = vld [vmem:[%s263_s5] sm:$0x1] }
   0x9   :  { %v113_v9 = vld [vmem:[#allocation2] sm:$0x1] }
   0xc   :  { %36 = vperm.xlu0 %177, %v32_v6  }
   0xe   :  { %116 = vperm.xlu1 %178, %v113_v9  }
  0x76   :  { %v42_v10 = vpop.permute.xlu0 %41 }
  0x78   :  { %v85_v19 = vpop.permute.xlu1 %84 }
  0x7e   :  { %v37_v11 = vpop.permute.xlu0 %36 }
  0x80   :  { %v117_v24 = vpop.permute.xlu1 %116 }
  0x81   :  { %v119_v25 = vperm.slane %v117_v24, 0 }
  0x82   :  { %v72_v12 = vpop.f32.mrf.mxu0 }
  0x83   :  { %v73_v14 = vadd.f32 %v72_v12, %v37_v11 }
  0x85   :  { %v78_v17 = vmax.f32 %v73_v14, 0.0 }
  0x89   :  { %v75_v13 = vpop.f32.mrf.mxu3 }
  0x8a   :  { %v76_v15 = vadd.f32 %v75_v13, %v42_v10 }
  0x8c   :  { %v79_v16 = vmax.f32 %v76_v15, 0.0 }
  0x8e   :  { %105 = vmatpush.msra.mxu1 %v79_v16 }
  0x90   :  { %106 = vmatpush.msra.mxu1 %v78_v17 }
  0x91   :  { %171 = vmatmul.msk.f32.vlgmr.msra.gmra.mxu1 %vm87_vm2, %v80_v18 }
 0x10e   :  { %v108_v20 = vpop.f32.mrf.mxu1 }
 0x10f   :  { %v109_v21 = vadd.f32 %v108_v20, %v85_v19 }
 0x111   :  { %v111_v22 = vmax.f32 %v109_v21, 0.0 }
 0x113   :  { %139 = vmatpush.msra.mxu2 %v111_v22 }
 0x114   :  { %172 = vmatmul.msk.f32.vlgmr.msra.gmra.mxu2 %vm120_vm3, %v112_v23 }
 0x197   :  { %v141_v26 = vpop.f32.mrf.mxu2 }
 0x198   :  { %v142_v27 = vadd.f32 %v141_v26, %v119_v25 }
 0x19a   :  { %v173_v28 = vmul.f32 -1.442695, %v142_v27 }
 0x19c   :  { %179 = vpow2.f32 %v173_v28 }
 0x1a2   :  { %v180_v29 = vpop.eup %179 }
 0x1a3   :  { %v147_v30 = vadd.f32 1.0, %v180_v29 }
 0x1a5   :  { %181 = vrcp.f32 %v147_v30  ;;  %v159_v34 = vand.u32 2147483648, %v147_v30  ;;  %v157_v36 = vand.u32 2147483647, %v147_v30  ;;  %vm153_vm5 = vweird.f32 %v147_v30 }
 0x1a7   :  { %v160_v38 = vor.u32 1.1754944e-38, %v159_v34  ;;  %vm158_vm7 = vcmp.eq.f32.partialorder %v157_v36, 8.507059e+37 }
 0x1ab   :  { %v182_v31 = vpop.eup %181 }
 0x1ac   :  { %v149_v32 = vmul.f32 %v182_v31, %v147_v30  ;;  %vm154_vm4 = vweird.f32 %v182_v31 }
 0x1ad   :  { %vm155_vm6 = vmor %vm153_vm5, %vm154_vm4 }
 0x1ae   :  { %v150_v33 = vsub.f32 1.0, %v149_v32 }
 0x1b0   :  { %v151_v35 = vmul.f32 %v182_v31, %v150_v33 }
 0x1b2   :  { %v152_v37 = vadd.f32 %v182_v31, %v151_v35 }
 0x1b4   :  { %v156_v39 = vsel %vm155_vm6, %v182_v31, %v152_v37 }
 0x1b5   :  { %v161_v40 = vsel %vm158_vm7, %v160_v38, %v156_v39 }
 0x1b6   :  { %163 = vst [vmem:[%s264_s7] sm:$0x1] %v161_v40 }

</bundles_post_ra>
